<compile_context>
chip_gen: v5e
topology: v5e:2x2
jax: 0.10.0
libtpu: 0.0.40
codegen_flags: <defaults>
</compile_context>

<pallas_src>
import functools

import jax
import jax.numpy as jnp
from jax.experimental import pallas as pl
from jax.experimental.pallas import tpu as pltpu


def _sine_kernel(x_ref, o_ref, *, w0):
    # Elementwise on the whole VMEM tile. Compute in f32 (VPU/EUP), cast back.
    x = x_ref[...].astype(jnp.float32)
    o_ref[...] = jnp.sin(x * w0).astype(o_ref.dtype)


def sine(x, w0=1.0, *, min_pallas_bytes=128 * 1024):
    """Apply y = sin(w0 * x) elementwise via a Pallas TPU kernel.

    x: any-rank array (e.g. NCHW). Returns an array of the same shape/dtype.
    min_pallas_bytes: inputs smaller than this take a plain-XLA fast path
      (set to 0 to force the Pallas kernel).
    """
    x = jnp.asarray(x)
    orig_shape = x.shape
    orig_dtype = x.dtype
    total = int(x.size)

    if total == 0:
        return x

    itemsize = jnp.dtype(orig_dtype).itemsize
    nbytes = total * itemsize

    # Small-input fast path: launch + DMA setup dwarfs the work.
    if nbytes < min_pallas_bytes:
        return jnp.sin(x.astype(jnp.float32) * float(w0)).astype(orig_dtype)

    # --- Lane-dense flattening -------------------------------------------
    LANE = 128
    sub_mult = {1: 32, 2: 16, 4: 8}.get(itemsize, 8)

    cols = 1024                     # large multiple of 128 -> full vregs
    while cols > LANE and total < cols:
        cols //= 2

    flat = x.reshape(-1)
    rows = pl.cdiv(total, cols)
    padded_total = rows * cols
    if padded_total != total:
        flat = jnp.pad(flat, (0, padded_total - total))
    x2d = flat.reshape(rows, cols)

    # --- Block sizing: ~2 MiB per block, dtype-aware sublane multiple ------
    target_block_bytes = 2 << 20
    row_tile = min(rows, max(sub_mult, target_block_bytes // (cols * itemsize)))
    if row_tile < rows:
        # Interior blocks must respect the (sub_mult, 128) minimum tiling.
        row_tile = max(sub_mult, (row_tile // sub_mult) * sub_mult)
    # else: block spans the full row extent, which is always legal.

    grid = (pl.cdiv(rows, row_tile),)   # last block may be partial (clamped)

    kernel = functools.partial(_sine_kernel, w0=float(w0))

    out2d = pl.pallas_call(
        kernel,
        out_shape=jax.ShapeDtypeStruct((rows, cols), orig_dtype),
        grid_spec=pltpu.PrefetchScalarGridSpec(
            num_scalar_prefetch=0,
            grid=grid,
            in_specs=[pl.BlockSpec((row_tile, cols), lambda i: (i, 0))],
            out_specs=pl.BlockSpec((row_tile, cols), lambda i: (i, 0)),
        ),
        compiler_params=pltpu.CompilerParams(
            dimension_semantics=("parallel",),
        ),
    )(x2d)

    out_flat = out2d.reshape(-1)
    if padded_total != total:
        out_flat = out_flat[:total]
    return out_flat.reshape(orig_shape)


if __name__ == "__main__":
    key = jax.random.PRNGKey(0)
    k1, k2, k3 = jax.random.split(key, 3)
    w0 = 30.0  # typical SIREN first-layer w0; module default is 1.0

    # 1) Small NCHW input consistent with the module's usage inside SIREN
    #    nets; force the Pallas path so the kernel itself is exercised.
    x_small = jax.random.normal(k1, (2, 4, 16, 16), dtype=jnp.float32)
    y_small = jax.block_until_ready(sine(x_small, w0=w0, min_pallas_bytes=0))
    ref_small = jnp.sin(w0 * x_small)
    assert y_small.shape == x_small.shape and y_small.dtype == x_small.dtype
    assert jnp.max(jnp.abs(y_small - ref_small)) < 1e-5

    # 2) Larger, oddly-shaped input: exercises lane padding, multiple grid
    #    steps and a partial final row-block (rows=767, row_tile=512).
    x_big = jax.random.normal(k2, (2, 8, 191, 257), dtype=jnp.float32)
    y_big = jax.block_until_ready(sine(x_big, w0=w0, min_pallas_bytes=0))
    ref_big = jnp.sin(w0 * x_big)
    assert y_big.shape == x_big.shape and y_big.dtype == x_big.dtype
    assert jnp.max(jnp.abs(y_big - ref_big)) < 1e-5

    # 3) bf16 input: kernel upcasts to f32 for the sin, casts back.
    x_bf = jax.random.normal(k3, (2, 4, 16, 16), dtype=jnp.bfloat16)
    y_bf = jax.block_until_ready(sine(x_bf, w0=w0, min_pallas_bytes=0))
    ref_bf = jnp.sin(w0 * x_bf.astype(jnp.float32)).astype(jnp.bfloat16)
    assert y_bf.shape == x_bf.shape and y_bf.dtype == x_bf.dtype
    assert jnp.max(jnp.abs(y_bf.astype(jnp.float32)
                           - ref_bf.astype(jnp.float32))) < 1e-2

    print("KERNEL_OK")
</pallas_src>

<mosaic_0001>
module attributes {stable_mosaic.version = 11 : i64} {
  func.func @_sine_kernel(%arg0: i32, %arg1: memref<2x1024xf32, #tpu.memory_space<vmem>>, %arg2: memref<2x1024xf32, #tpu.memory_space<vmem>>) attributes {dimension_semantics = [#tpu.dimension_semantics<parallel>], iteration_bounds = array<i64: 1>, scalar_prefetch = 0 : i64, scratch_operands = 0 : i64, tpu.core_type = #tpu.core_type<tc>, window_params = [{transform_indices = @transform_0, window_bounds = array<i64: 2, 1024>}, {transform_indices = @transform_1, window_bounds = array<i64: 2, 1024>}]} {
    %c0 = arith.constant 0 : index
    %c0_0 = arith.constant 0 : index
    %0 = vector.load %arg1[%c0, %c0_0] : memref<2x1024xf32, #tpu.memory_space<vmem>>, vector<2x1024xf32>
    %cst = arith.constant 3.000000e+01 : f32
    %1 = vector.broadcast %cst : f32 to vector<2x1024xf32>
    %2 = arith.mulf %0, %1 : vector<2x1024xf32>
    %3 = math.sin %2 : vector<2x1024xf32>
    %c0_1 = arith.constant 0 : index
    %c0_2 = arith.constant 0 : index
    %4 = vector.load %arg2[%c0_1, %c0_2] : memref<2x1024xf32, #tpu.memory_space<vmem>>, vector<2x1024xf32>
    tpu.vector_store %arg2[%c0_1, %c0_2], %3 {strides = array<i32>} : memref<2x1024xf32, #tpu.memory_space<vmem>>, vector<2x1024xf32>,
    return
  }
  func.func @transform_0(%arg0: i32) -> (i32, i32) {
    %c0_i32 = arith.constant 0 : i32
    %c0_i32_0 = arith.constant 0 : i32
    return %arg0, %c0_i32 : i32, i32
  }
  func.func @transform_1(%arg0: i32) -> (i32, i32) {
    %c0_i32 = arith.constant 0 : i32
    %c0_i32_0 = arith.constant 0 : i32
    return %arg0, %c0_i32 : i32, i32
  }
}

</mosaic_0001>

<bundles_post_ra>
// kernel: tpu_custom_call.1
= control target key start
LH: loop header
LB: loop body
LE: loop exit
PB: predicated region body
PF: predicated region fallthrough
CT: control target
= control target key end

     0   :  { %6 = vsyncpa [#allocation3], 0  ;;  %s621_s0 = inlined_call_operand.hbm [shape: f32[2,1024], index: 0, kind: input, shape index: {}]   ;;  %s622_s1 = inlined_call_operand.hbm [shape: f32[2,1024], index: 1, kind: output, shape index: {}]  }
   0x1   :  { %7 = vsyncpa [#allocation4], 0  ;;  %s13_s8 = sshll.u32 %s621_s0, 4  ;;  %s423_s9 = smov [#allocation2]   ;;  %s14_s8 = int_to_ptr.hbm [resolvable:$true] %s13_s8 }
   0x2   :  { %s15_s10 = sshll.u32 %s423_s9, 4  ;;  %s16_s10 = int_to_ptr.vmem [resolvable:$true] %s15_s10 }
   0x3   :  { %18 = dma.hbm_to_vmem [thread:$0]  %s14_s8, 256, %s16_s10, [#allocation3]  }
   0x4   :  { %419 = dma.done.wait [#allocation3], 256  }
   0x5   :  { %420 = vsyncadd [#allocation3], 4294967040  ;;  %v23_v0 = vld [vmem:[#allocation2] sm:$0xff]  ;;  %v24_v1 = vld [vmem:[#allocation2 + $0x8] sm:$0xff]  ;;  %v424_v25 = vmov 683565275  }
   0x6   :  { %v445_v2 = vmul.f32 30.0, %v23_v0  ;;  %v447_v3 = vmul.f32 30.0, %v24_v1  ;;  %v425_v27 = vmov 2475754826   ;;  %v426_v29 = vmov 2131351028  }
   0x7   :  { %v427_v31 = vmov 2102212464   ;;  %v428_v33 = vmov 920167782   ;;  %v429_v42 = vmov 1326507024  }
   0x8   :  { %v27_v4 = vand.u32 2147483647, %v445_v2  ;;  %v30_v5 = vand.u32 2139095040, %v445_v2  ;;  %v182_v6 = vand.u32 2147483647, %v447_v3  ;;  %v185_v7 = vand.u32 2139095040, %v447_v3 }
   0x9   :  { %s431_s0 = smov [#allocation5]   ;;  %s346_s14 = sshll.u32 %s622_s1, 4  ;;  %s347_s14 = int_to_ptr.hbm [resolvable:$true] %s346_s14 }
   0xa   :  { %v31_v8 = vshrl.u32 %v30_v5, 23  ;;  %v34_v9 = vand.u32 8388607, %v27_v4  ;;  %v186_v10 = vshrl.u32 %v185_v7, 23  ;;  %v189_v14 = vand.u32 8388607, %v182_v6 }
   0xb   :  { %s344_s11 = sshll.u32 %s431_s0, 4  ;;  %s345_s11 = int_to_ptr.vmem [resolvable:$true] %s344_s11 }
   0xc   :  { %v356_v11 = vadd.s32 4294967169, %v31_v8  ;;  %v35_v12 = vor.u32 8388608, %v34_v9  ;;  %v359_v13 = vadd.s32 4294967169, %v186_v10  ;;  %v190_v19 = vor.u32 8388608, %v189_v14 }
   0xe   :  { %v37_v15 = vadd.s32 1, %v356_v11  ;;  %v192_v16 = vadd.s32 1, %v359_v13  ;;  %v457_v18 = vshll.u32 %v35_v12, 8  ;;  %v467_v36 = vshll.u32 %v190_v19, 8 }
  0x10   :  { %vm38_vm0 = vcmp.gt.s32.totalorder %v37_v15, 0  ;;  %vm193_vm1 = vcmp.gt.s32.totalorder %v192_v16, 0  ;;  %v76_v35 = vand.u32 65535, %v457_v18  ;;  %v77_v40 = vshrl.u32 %v457_v18, 16 }
  0x11   :  { %v39_v17 = vsel %vm38_vm0, %v37_v15, 0  ;;  %v194_v21 = vsel %vm193_vm1, %v192_v16, 0 }
  0x12   :  { %v41_v20 = vand.u32 31, %v39_v17  ;;  %v459_v22 = vshrl.u32 %v39_v17, 5  ;;  %v461_v23 = vand.u32 31, %v194_v21  ;;  %v485_v53 = vshrl.u32 %v194_v21, 5 }
  0x14   :  { %v42_v24 = vsub.s32 32, %v41_v20  ;;  %v44_v26 = vshll.u32 %v424_v25, %v41_v20  ;;  %v47_v28 = vshll.u32 %v425_v27, %v41_v20  ;;  %v50_v30 = vshll.u32 %v426_v29, %v41_v20 }
  0x15   :  { %v53_v32 = vshll.u32 %v427_v31, %v41_v20  ;;  %v56_v34 = vshll.u32 %v428_v33, %v41_v20  ;;  %vm59_vm2 = vcmp.lt.s32.totalorder %v459_v22, 1  ;;  %vm62_vm3 = vcmp.lt.s32.totalorder %v459_v22, 4 }
  0x16   :  { %v45_v37 = vshrl.u32 %v425_v27, %v42_v24  ;;  %v48_v38 = vshrl.u32 %v426_v29, %v42_v24  ;;  %v51_v39 = vshrl.u32 %v427_v31, %v42_v24  ;;  %v54_v41 = vshrl.u32 %v428_v33, %v42_v24 }
  0x17   :  { %v57_v43 = vshrl.u32 %v429_v42, %v42_v24  ;;  %v476_v47 = vsub.s32 32, %v461_v23  ;;  %v43_v48 = vshrl.u32 %v424_v25, %v42_v24  ;;  %vm61_vm4 = vcmp.lt.s32.totalorder %v459_v22, 3 }
  0x18   :  { %v46_v44 = vor.u32 %v45_v37, %v44_v26  ;;  %v49_v45 = vor.u32 %v48_v38, %v47_v28  ;;  %v52_v46 = vor.u32 %v51_v39, %v50_v30  ;;  %v55_v49 = vor.u32 %v54_v41, %v53_v32 }
  0x19   :  { %v58_v50 = vor.u32 %v57_v43, %v56_v34  ;;  %vm60_vm5 = vcmp.lt.s32.totalorder %v459_v22, 2  ;;  %v199_v56 = vshll.u32 %v424_v25, %v461_v23  ;;  %v202_v57 = vshll.u32 %v425_v27, %v461_v23 }
  0x1a   :  { %v67_v51 = vsel %vm59_vm2, %v46_v44, %v49_v45  ;;  %v71_v52 = vsel %vm59_vm2, %v49_v45, %v52_v46  ;;  %v68_v54 = vsel %vm62_vm3, %v55_v49, 920167782  ;;  %v64_v58 = vsel %vm62_vm3, %v52_v46, 2102212464 }
  0x1b   :  { %v72_v55 = vsel %vm62_vm3, %v58_v50, 1326507024  ;;  %v69_v59 = vsel %vm61_vm4, %v52_v46, %v68_v54  ;;  %v200_v61 = vshrl.u32 %v425_v27, %v476_v47  ;;  %v63_v62 = vsel %vm59_vm2, %v43_v48, %v46_v44 }
  0x1c   :  { %v73_v60 = vsel %vm61_vm4, %v55_v49, %v72_v55  ;;  %v70_v63 = vsel %vm60_vm5, %v67_v51, %v69_v59  ;;  %v203_v1 = vshrl.u32 %v426_v29, %v476_v47  ;;  %v65_v10 = vsel %vm61_vm4, %v49_v45, %v64_v58 }
  0x1d   :  { %v74_v0 = vsel %vm60_vm5, %v71_v52, %v73_v60  ;;  %v100_v8 = vand.u32 65535, %v70_v63  ;;  %v101_v9 = vshrl.u32 %v70_v63, 16  ;;  %v510_v11 = vor.u32 %v200_v61, %v199_v56 }
  0x1e   :  { %v78_v5 = vand.u32 65535, %v74_v0  ;;  %v79_v7 = vshrl.u32 %v74_v0, 16  ;;  %v512_v12 = vor.u32 %v203_v1, %v202_v57  ;;  %v205_v13 = vshll.u32 %v426_v29, %v461_v23 }
  0x1f   :  { %v206_v17 = vshrl.u32 %v427_v31, %v476_v47  ;;  %v102_v20 = vmul.u32 %v100_v8, %v76_v35  ;;  %v103_v21 = vmul.u32 %v101_v9, %v76_v35  ;;  %v104_v24 = vmul.u32 %v100_v8, %v77_v40 }
  0x20   :  { %v80_v14 = vmul.u32 %v78_v5, %v76_v35  ;;  %v81_v15 = vmul.u32 %v79_v7, %v76_v35  ;;  %v82_v16 = vmul.u32 %v78_v5, %v77_v40  ;;  %v83_v19 = vmul.u32 %v79_v7, %v77_v40 }
  0x21   :  { %v105_v30 = vmul.u32 %v101_v9, %v77_v40  ;;  %v106_v34 = vshll.u32 %v103_v21, 16  ;;  %v107_v37 = vshrl.u32 %v103_v21, 16  ;;  %v108_v38 = vshll.u32 %v104_v24, 16 }
  0x22   :  { %v84_v26 = vshll.u32 %v81_v15, 16  ;;  %v85_v27 = vshrl.u32 %v81_v15, 16  ;;  %v86_v28 = vshll.u32 %v82_v16, 16  ;;  %v87_v32 = vshrl.u32 %v82_v16, 16 }
  0x23   :  { %v109_v39 = vshrl.u32 %v104_v24, 16  ;;  %v208_v41 = vshll.u32 %v427_v31, %v461_v23  ;;  %v430_v43 = vmov 0   ;;  %vm110_vm7 = vc.u32 %v102_v20, %v106_v34 }
  0x24   :  { %vm88_vm6 = vc.u32 %v80_v14, %v84_v26  ;;  %v90_v29 = vadd.s32 %v84_v26, %v80_v14  ;;  %v112_v35 = vadd.s32 %v106_v34, %v102_v20  ;;  %v209_v45 = vshrl.u32 %v428_v33, %v476_v47 }
  0x25   :  { %v89_v44 = vsel %vm88_vm6, 1, %v430_v43  ;;  %v111_v40 = vsel %vm110_vm7, 1, %v430_v43  ;;  %v211_v48 = vshll.u32 %v428_v33, %v461_v23  ;;  %v207_v31 = vor.u32 %v206_v17, %v205_v13 }
  0x26   :  { %v91_v46 = vadd.s32 %v89_v44, %v83_v19  ;;  %vm92_vm8 = vc.u32 %v90_v29, %v86_v28  ;;  %v113_v50 = vadd.s32 %v111_v40, %v105_v30  ;;  %vm114_vm9 = vc.u32 %v112_v35, %v108_v38 }
  0x27   :  { %v93_v49 = vsel %vm92_vm8, 1, %v430_v43  ;;  %v115_v52 = vsel %vm114_vm9, 1, %v430_v43  ;;  %v210_v54 = vor.u32 %v209_v45, %v208_v41  ;;  %v212_v55 = vshrl.u32 %v429_v42, %v476_v47 }
  0x28   :  { %v95_v51 = vadd.s32 %v93_v49, %v91_v46  ;;  %v529_v56 = vadd.s32 %v112_v35, %v108_v38  ;;  %v117_v57 = vadd.s32 %v115_v52, %v113_v50  ;;  %vm214_vm10 = vcmp.lt.s32.totalorder %v485_v53, 1 }
  0x29   :  { %vm216_vm11 = vcmp.lt.s32.totalorder %v485_v53, 3  ;;  %v213_v33 = vor.u32 %v212_v55, %v211_v48  ;;  %vm215_vm12 = vcmp.lt.s32.totalorder %v485_v53, 2  ;;  %vm217_vm13 = vcmp.lt.s32.totalorder %v485_v53, 4 }
  0x2a   :  { %v96_v23 = vadd.s32 %v95_v51, %v85_v27  ;;  %v66_v58 = vsel %vm60_vm5, %v63_v62, %v65_v10  ;;  %v118_v59 = vadd.s32 %v117_v57, %v107_v37  ;;  %v222_v42 = vsel %vm214_vm10, %v510_v11, %v512_v12 }
  0x2b   :  { %v223_v60 = vsel %vm217_vm13, %v210_v54, 920167782  ;;  %v226_v0 = vsel %vm214_vm10, %v512_v12, %v207_v31  ;;  %v231_v22 = vand.u32 65535, %v467_v36  ;;  %v227_v5 = vsel %vm217_vm13, %v213_v33, 1326507024 }
  0x2c   :  { %v543_v61 = vadd.s32 %v96_v23, %v87_v32  ;;  %v224_v63 = vsel %vm216_vm11, %v207_v31, %v223_v60  ;;  %v119_v62 = vadd.s32 %v118_v59, %v109_v39  ;;  %v232_v7 = vshrl.u32 %v467_v36, 16 }
  0x2d   :  { %v225_v1 = vsel %vm215_vm12, %v222_v42, %v224_v63  ;;  %v120_v8 = vmul.u32 %v457_v18, %v66_v58  ;;  %v228_v9 = vsel %vm216_vm11, %v210_v54, %v227_v5  ;;  %v198_v20 = vshrl.u32 %v424_v25, %v476_v47 }
  0x2e   :  { %vm122_vm14 = vc.u32 %v543_v61, %v529_v56  ;;  %v255_v10 = vand.u32 65535, %v225_v1  ;;  %v123_v13 = vadd.s32 1, %v119_v62  ;;  %v229_v14 = vsel %vm215_vm12, %v226_v0, %v228_v9 }
  0x2f   :  { %v256_v15 = vshrl.u32 %v225_v1, 16  ;;  %v233_v16 = vand.u32 65535, %v229_v14  ;;  %v234_v17 = vshrl.u32 %v229_v14, 16  ;;  %v219_v37 = vsel %vm217_vm13, %v207_v31, 2102212464 }
  0x30   :  { %v124_v19 = vsel %vm122_vm14, %v123_v13, %v119_v62  ;;  %v259_v18 = vmul.u32 %v255_v10, %v232_v7  ;;  %v257_v28 = vmul.u32 %v255_v10, %v231_v22  ;;  %v218_v39 = vsel %vm214_vm10, %v198_v20, %v510_v11 }
  0x31   :  { %v258_v21 = vmul.u32 %v256_v15, %v231_v22  ;;  %v125_v24 = vadd.s32 %v124_v19, %v120_v8  ;;  %v235_v26 = vmul.u32 %v233_v16, %v231_v22  ;;  %v236_v27 = vmul.u32 %v234_v17, %v231_v22 }
  0x32   :  { %v237_v30 = vmul.u32 %v233_v16, %v232_v7  ;;  %v238_v38 = vmul.u32 %v234_v17, %v232_v7  ;;  %v260_v25 = vmul.u32 %v256_v15, %v232_v7  ;;  %v263_v47 = vshll.u32 %v259_v18, 16 }
  0x33   :  { %v261_v32 = vshll.u32 %v258_v21, 16  ;;  %v126_v34 = vadd.s32 536870912, %v125_v24  ;;  %v239_v29 = vshll.u32 %v236_v27, 16  ;;  %v220_v45 = vsel %vm216_vm11, %v512_v12, %v219_v37 }
  0x34   :  { %v241_v41 = vshll.u32 %v237_v30, 16  ;;  %v240_v11 = vshrl.u32 %v236_v27, 16  ;;  %v262_v51 = vshrl.u32 %v258_v21, 16  ;;  %v242_v55 = vshrl.u32 %v237_v30, 16 }
  0x35   :  { %v570_v44 = vshrl.u32 %v126_v34, 30  ;;  %vm243_vm15 = vc.u32 %v235_v26, %v239_v29  ;;  %v245_v35 = vadd.s32 %v239_v29, %v235_v26  ;;  %vm265_vm0 = vc.u32 %v257_v28, %v261_v32 }
  0x36   :  { %v244_v46 = vsel %vm243_vm15, 1, %v430_v43  ;;  %v266_v40 = vsel %vm265_vm0, 1, %v430_v43  ;;  %v267_v48 = vadd.s32 %v261_v32, %v257_v28  ;;  %v264_v23 = vshrl.u32 %v259_v18, 16 }
  0x37   :  { %v128_v49 = vshll.u32 %v570_v44, 30  ;;  %v246_v50 = vadd.s32 %v244_v46, %v238_v38  ;;  %vm247_vm1 = vc.u32 %v245_v35, %v241_v41  ;;  %v268_v52 = vadd.s32 %v266_v40, %v260_v25 }
  0x38   :  { %v248_v31 = vsel %vm247_vm1, 1, %v430_v43  ;;  %vm269_vm2 = vc.u32 %v267_v48, %v263_v47  ;;  %v271_v42 = vadd.s32 %v267_v48, %v263_v47  ;;  %v221_v60 = vsel %vm215_vm12, %v218_v39, %v220_v45 }
  0x39   :  { %v129_v54 = vsub.s32 %v125_v24, %v128_v49  ;;  %v250_v57 = vadd.s32 %v248_v31, %v246_v50  ;;  %v270_v12 = vsel %vm269_vm2, 1, %v430_v43  ;;  %v275_v5 = vmul.u32 %v467_v36, %v221_v60 }
  0x3a   :  { %v272_v33 = vadd.s32 %v270_v12, %v268_v52  ;;  %v121_v43 = vadd.s32 %v529_v56, %v543_v61  ;;  %v151_v30 = vsub.s32 4, %v570_v44  ;;  %vm29_vm7 = vcmp.lt.s32.totalorder %v445_v2, 0 }
  0x3b   :  { %vm130_vm3 = vcmp.lt.s32.totalorder %v129_v54, 0  ;;  %v131_v58 = vsub.s32 0, %v129_v54  ;;  %v251_v59 = vadd.s32 %v250_v57, %v240_v11  ;;  %vm592_vm8 = vcmp.le.f32.partialorder %v27_v4, 0.7853982 }
  0x3c   :  { %v273_v63 = vadd.s32 %v272_v33, %v262_v51  ;;  %v152_v39 = vsel %vm29_vm7, %v151_v30, %v570_v44  ;;  %vm184_vm11 = vcmp.lt.s32.totalorder %v447_v3, 0  ;;  %vm606_vm13 = vcmp.le.f32.partialorder %v182_v6, 0.7853982 }
  0x3d   :  { %v132_v0 = vsel %vm130_vm3, %v131_v58, %v129_v54  ;;  %v252_v22 = vadd.s32 %v251_v59, %v242_v55  ;;  %v154_v45 = vsel %vm592_vm8, 0, %v152_v39  ;;  %vm170_vm15 = vweird.f32 %v445_v2 }
  0x3e   :  { %v133_v62 = vclz %v132_v0  ;;  %v274_v1 = vadd.s32 %v273_v63, %v264_v23  ;;  %v171_v51 = vadd.s32 3, %v154_v45  ;;  %vm325_vm3 = vweird.f32 %v447_v3 }
  0x3f   :  { %vm277_vm4 = vc.u32 %v252_v22, %v271_v42  ;;  %v276_v35 = vadd.s32 %v271_v42, %v252_v22 }
  0x40   :  { %v357_v7 = vadd.s32 4294967294, %v133_v62  ;;  %v278_v8 = vadd.s32 1, %v274_v1  ;;  %v172_v58 = vand.u32 3, %v171_v51 }
  0x42   :  { %vm358_vm5 = vcmp.lt.s32.totalorder %v357_v7, 0  ;;  %v279_v9 = vsel %vm277_vm4, %v278_v8, %v274_v1  ;;  %vm177_vm10 = vcmp.eq.s32.totalorder %v172_v58, 2  ;;  %vm174_vm12 = vcmp.eq.s32.totalorder %v172_v58, 0 }
  0x43   :  { %v136_v10 = vsel %vm358_vm5, 0, %v357_v7  ;;  %v280_v13 = vadd.s32 %v279_v9, %v275_v5  ;;  %vm173_vm14 = vcmp.lt.s32.totalorder %v172_v58, 2 }
  0x44   :  { %v137_v14 = vsub.s32 32, %v136_v10  ;;  %v138_v53 = vshll.u32 %v129_v54, %v136_v10  ;;  %v141_v15 = vsub.s32 4294967266, %v136_v10 }
  0x45   :  { %v281_v16 = vadd.s32 536870912, %v280_v13 }
  0x46   :  { %v139_v17 = vshrl.u32 %v121_v43, %v137_v14  ;;  %v142_v19 = vadd.s32 127, %v141_v15 }
  0x47   :  { %v585_v20 = vshrl.u32 %v281_v16, 30 }
  0x48   :  { %v140_v21 = vor.u32 %v139_v17, %v138_v53  ;;  %v143_v36 = vshll.u32 %v142_v19, 23 }
  0x49   :  { %v283_v18 = vshll.u32 %v585_v20, 30  ;;  %v306_v8 = vsub.s32 4, %v585_v20 }
  0x4a   :  { %v144_v24 = vor.u32 4788187, %v143_v36  ;;  %v147_v26 = vcvt.s32.f32 %v140_v21 }
  0x4b   :  { %v284_v27 = vsub.s32 %v280_v13, %v283_v18  ;;  %v307_v15 = vsel %vm184_vm11, %v306_v8, %v585_v20 }
  0x4c   :  { %v145_v56 = vand.u32 2147483647, %v144_v24  ;;  %v309_v21 = vsel %vm606_vm13, 0, %v307_v15 }
  0x4d   :  { %vm285_vm6 = vcmp.lt.s32.totalorder %v284_v27, 0  ;;  %v286_v61 = vsub.s32 0, %v284_v27 }
  0x4e   :  { %v148_v28 = vmul.f32 %v147_v26, %v145_v56 }
  0x4f   :  { %v287_v32 = vsel %vm285_vm6, %v286_v61, %v284_v27 }
  0x50   :  { %v149_v37 = vxor.u32 2147483648, %v148_v28  ;;  %v288_v38 = vclz %v287_v32 }
  0x52   :  { %v150_v29 = vsel %vm29_vm7, %v149_v37, %v148_v28  ;;  %v360_v41 = vadd.s32 4294967294, %v288_v38 }
  0x53   :  { %v153_v25 = vsel %vm592_vm8, %v445_v2, %v150_v29  ;;  %v326_v2 = vadd.s32 3, %v309_v21 }
  0x54   :  { %v155_v47 = vmul.f32 %v153_v25, %v153_v25  ;;  %vm361_vm9 = vcmp.lt.s32.totalorder %v360_v41, 0 }
  0x55   :  { %v291_v4 = vsel %vm361_vm9, 0, %v360_v41  ;;  %v327_v28 = vand.u32 3, %v326_v2 }
  0x56   :  { %v156_v46 = vmul.f32 -0.001358992, %v155_v47  ;;  %v163_v40 = vmul.f32 -0.00019511016, %v155_v47  ;;  %v292_v48 = vsub.s32 32, %v291_v4  ;;  %v293_v49 = vshll.u32 %v284_v27, %v291_v4 }
  0x57   :  { %v296_v11 = vsub.s32 4294967266, %v291_v4  ;;  %vm332_vm0 = vcmp.eq.s32.totalorder %v327_v28, 2  ;;  %vm329_vm1 = vcmp.eq.s32.totalorder %v327_v28, 0  ;;  %vm328_vm2 = vcmp.lt.s32.totalorder %v327_v28, 2 }
  0x58   :  { %v157_v50 = vadd.f32 0.041655596, %v156_v46  ;;  %v164_v31 = vadd.f32 0.008332121, %v163_v40  ;;  %v294_v44 = vshrl.u32 %v276_v35, %v292_v48 }
  0x59   :  { %v297_v52 = vadd.s32 127, %v296_v11 }
  0x5a   :  { %v158_v54 = vmul.f32 %v157_v50, %v155_v47  ;;  %v165_v55 = vmul.f32 %v164_v31, %v155_v47  ;;  %v295_v57 = vor.u32 %v294_v44, %v293_v49 }
  0x5b   :  { %v298_v12 = vshll.u32 %v297_v52, 23 }
  0x5c   :  { %v159_v23 = vadd.f32 -0.4999988, %v158_v54  ;;  %v166_v33 = vadd.f32 -0.16666654, %v165_v55  ;;  %v302_v42 = vcvt.s32.f32 %v295_v57 }
  0x5d   :  { %v299_v59 = vor.u32 4788187, %v298_v12 }
  0x5e   :  { %v160_v60 = vmul.f32 %v159_v23, %v155_v47  ;;  %v167_v63 = vmul.f32 %v166_v33, %v155_v47 }
  0x5f   :  { %v300_v0 = vand.u32 2147483647, %v299_v59 }
  0x60   :  { %v161_v22 = vadd.f32 1.0, %v160_v60  ;;  %v168_v62 = vadd.f32 1.0, %v167_v63 }
  0x61   :  { %v303_v1 = vmul.f32 %v302_v42, %v300_v0 }
  0x62   :  { %v169_v5 = vmul.f32 %v168_v62, %v153_v25  ;;  %v178_v7 = vxor.u32 2147483648, %v161_v22 }
  0x63   :  { %v304_v9 = vxor.u32 2147483648, %v303_v1 }
  0x64   :  { %v175_v10 = vxor.u32 2147483648, %v169_v5  ;;  %v179_v13 = vsel %vm177_vm10, %v178_v7, %v169_v5 }
  0x65   :  { %v305_v14 = vsel %vm184_vm11, %v304_v9, %v303_v1 }
  0x66   :  { %v176_v53 = vsel %vm174_vm12, %v161_v22, %v175_v10  ;;  %v308_v16 = vsel %vm606_vm13, %v447_v3, %v305_v14 }
  0x67   :  { %v180_v17 = vsel %vm173_vm14, %v176_v53, %v179_v13  ;;  %v310_v19 = vmul.f32 %v308_v16, %v308_v16 }
  0x68   :  { %v181_v6 = vsel %vm170_vm15, nan, %v180_v17 }
  0x69   :  { %v311_v36 = vmul.f32 -0.001358992, %v310_v19  ;;  %v318_v18 = vmul.f32 -0.00019511016, %v310_v19  ;;  %337 = vst [vmem:[#allocation5] sm:$0xff] %v181_v6 }
  0x6b   :  { %v312_v24 = vadd.f32 0.041655596, %v311_v36  ;;  %v319_v26 = vadd.f32 0.008332121, %v318_v18 }
  0x6d   :  { %v313_v27 = vmul.f32 %v312_v24, %v310_v19  ;;  %v320_v56 = vmul.f32 %v319_v26, %v310_v19 }
  0x6f   :  { %v314_v61 = vadd.f32 -0.4999988, %v313_v27  ;;  %v321_v20 = vadd.f32 -0.16666654, %v320_v56 }
  0x71   :  { %v315_v30 = vmul.f32 %v314_v61, %v310_v19  ;;  %v322_v32 = vmul.f32 %v321_v20, %v310_v19 }
  0x73   :  { %v316_v34 = vadd.f32 1.0, %v315_v30  ;;  %v323_v37 = vadd.f32 1.0, %v322_v32 }
  0x75   :  { %v324_v38 = vmul.f32 %v323_v37, %v308_v16  ;;  %v333_v29 = vxor.u32 2147483648, %v316_v34 }
  0x77   :  { %v330_v39 = vxor.u32 2147483648, %v324_v38  ;;  %v334_v41 = vsel %vm332_vm0, %v333_v29, %v324_v38 }
  0x79   :  { %v331_v25 = vsel %vm329_vm1, %v316_v34, %v330_v39 }
  0x7a   :  { %v335_v47 = vsel %vm328_vm2, %v331_v25, %v334_v41 }
  0x7b   :  { %v336_v35 = vsel %vm325_vm3, nan, %v335_v47 }
  0x7c   :  { %338 = vst [vmem:[#allocation5 + $0x8] sm:$0xff] %v336_v35 }
  0x7d   :  { %349 = dma.vmem_to_hbm [thread:$0]  %s345_s11, 256, %s347_s14, [#allocation4]  }
  0x7e   :  { %421 = dma.done.wait [#allocation4], 256  }
  0x7f   :  { %422 = vsyncadd [#allocation4], 4294967040 }
  0x80   :  { %354 = vsyncpa [#allocation3], 1 }
  0x81   :  { %355 = vsyncpa [#allocation4], 1 }

</bundles_post_ra>
